<compile_context>
chip_gen: v7x
topology: tpu7x:2x2x1
jax: 0.10.0
libtpu: 0.0.40
codegen_flags: <defaults>
</compile_context>

<pallas_src>
import jax
import jax.numpy as jnp
from jax.experimental import pallas as pl
from jax.experimental.pallas import tpu as pltpu


def _head_kernel(x_ref, w1_ref, b1_ref, w2_ref, b2_ref, o_ref):
    # x_ref : [TB, 2H] bf16    w1_ref: [2H, H]  bf16   b1_ref: [1, H]    f32
    # w2_ref: [H, NPAD] bf16   b2_ref: [1, NPAD] f32   o_ref : [TB, NPAD] f32
    h = jnp.dot(x_ref[...], w1_ref[...], preferred_element_type=jnp.float32)
    h = jnp.tanh(h + b1_ref[...])                       # f32 VPU/EUP path
    out = jnp.dot(h.astype(w2_ref.dtype), w2_ref[...],
                  preferred_element_type=jnp.float32) + b2_ref[...]
    o_ref[...] = out.astype(o_ref.dtype)


def _round_up(a, m):
    return (a + m - 1) // m * m


def roberta_classification_head(x, w1, b1, w2, b2, *, tb=512, lane_pad=128):
    """x: [batch, 2, hidden].  w1: [2H, H], b1: [H], w2: [H, n_cls], b2: [n_cls].

    Returns logits [batch, n_cls] (n_cls = 2 for the clone-detection head).
    Weights are stored already transposed ([in, out]) relative to nn.Linear.
    """
    hidden = x.shape[-1]
    x_flat = x.reshape(-1, 2 * hidden)          # torch: x.reshape(-1, x.size(-1)*2)
    B, twoH = x_flat.shape
    H = w1.shape[1]
    n_cls = w2.shape[1]

    # Lane-dense output slab: pad class dim to a multiple of 128 lanes.
    NPAD = _round_up(max(n_cls, lane_pad), 128)

    # Batch tile: multiple of 8 sublanes, capped at `tb` (512 keeps us near the
    # HBM roofline on v5e/v6e/v7x while fitting the scoped-VMEM defaults in bf16).
    TB = min(tb, _round_up(B, 8))
    B_pad = _round_up(B, TB)
    if B_pad != B:
        x_flat = jnp.pad(x_flat, ((0, B_pad - B), (0, 0)))

    # bf16 matmul operands, f32 accumulation / elementwise.
    x_bf = x_flat.astype(jnp.bfloat16)
    w1_bf = w1.astype(jnp.bfloat16)
    w2_bf = jnp.pad(w2.astype(jnp.bfloat16), ((0, 0), (0, NPAD - n_cls)))
    b1_2d = b1.reshape(1, H).astype(jnp.float32)
    b2_2d = jnp.pad(b2.reshape(1, n_cls).astype(jnp.float32),
                    ((0, 0), (0, NPAD - n_cls)))

    grid = (B_pad // TB,)
    flops = 2 * B_pad * twoH * H + 2 * B_pad * H * NPAD
    bytes_accessed = (x_bf.size * 2 + w1_bf.size * 2 + w2_bf.size * 2
                      + b1_2d.size * 4 + b2_2d.size * 4 + B_pad * NPAD * 4)

    out_padded = pl.pallas_call(
        _head_kernel,
        out_shape=jax.ShapeDtypeStruct((B_pad, NPAD), jnp.float32),
        grid=grid,
        in_specs=[
            pl.BlockSpec((TB, twoH), lambda i: (i, 0)),     # x: streamed per tile
            pl.BlockSpec((twoH, H), lambda i: (0, 0)),      # w1: resident
            pl.BlockSpec((1, H), lambda i: (0, 0)),         # b1: resident
            pl.BlockSpec((H, NPAD), lambda i: (0, 0)),      # w2: resident
            pl.BlockSpec((1, NPAD), lambda i: (0, 0)),      # b2: resident
        ],
        out_specs=pl.BlockSpec((TB, NPAD), lambda i: (i, 0)),
        compiler_params=pltpu.CompilerParams(
            dimension_semantics=("parallel",)),
        cost_estimate=pl.CostEstimate(
            flops=flops,
            transcendentals=B_pad * H,
            bytes_accessed=bytes_accessed),
    )(x_bf, w1_bf, b1_2d, w2_bf, b2_2d)

    return out_padded[:B, :n_cls].astype(x.dtype)


def reference(x, w1, b1, w2, b2):
    hidden = x.shape[-1]
    xf = x.reshape(-1, 2 * hidden)
    h = jnp.tanh(xf @ w1 + b1)
    return h @ w2 + b2


if __name__ == "__main__":
    # config.hidden_size = 32 (small, test-scale); batch = 4 pairs
    hidden = 32
    batch = 4
    key = jax.random.PRNGKey(0)
    kx, kw1, kb1, kw2, kb2 = jax.random.split(key, 5)

    # module input: [batch, 2, hidden] (two pooled representations per example)
    x = jax.random.normal(kx, (batch, 2, hidden), dtype=jnp.float32)

    # nn.Linear(hidden*2, hidden): weight [H, 2H] -> stored transposed [2H, H]
    w1 = jax.random.normal(kw1, (2 * hidden, hidden), dtype=jnp.float32) * 0.05
    b1 = jax.random.normal(kb1, (hidden,), dtype=jnp.float32) * 0.05
    # nn.Linear(hidden, 2): weight [2, H] -> stored transposed [H, 2]
    w2 = jax.random.normal(kw2, (hidden, 2), dtype=jnp.float32) * 0.05
    b2 = jax.random.normal(kb2, (2,), dtype=jnp.float32) * 0.05

    out = roberta_classification_head(x, w1, b1, w2, b2)
    out = jax.block_until_ready(out)

    ref = reference(x, w1, b1, w2, b2)
    assert out.shape == (batch, 2), out.shape
    # bf16 matmul inputs with f32 accumulation -> loosened tolerance on logits.
    assert jnp.allclose(out, ref, atol=2e-2, rtol=2e-2), (out, ref)

    print("KERNEL_OK")
</pallas_src>

<mosaic_0001>
module attributes {stable_mosaic.version = 11 : i64} {
  func.func @_head_kernel(%arg0: i32, %arg1: memref<8x64xbf16, #tpu.memory_space<vmem>>, %arg2: memref<64x32xbf16, #tpu.memory_space<vmem>>, %arg3: memref<1x32xf32, #tpu.memory_space<vmem>>, %arg4: memref<32x128xbf16, #tpu.memory_space<vmem>>, %arg5: memref<1x128xf32, #tpu.memory_space<vmem>>, %arg6: memref<8x128xf32, #tpu.memory_space<vmem>>) attributes {dimension_semantics = [#tpu.dimension_semantics<parallel>], iteration_bounds = array<i64: 1>, scalar_prefetch = 0 : i64, scratch_operands = 0 : i64, tpu.core_type = #tpu.core_type<tc>, window_params = [{transform_indices = @transform_0, window_bounds = array<i64: 8, 64>}, {pipeline_mode = #tpu.pipeline_mode<synchronous>, transform_indices = @transform_1, window_bounds = array<i64: 64, 32>}, {pipeline_mode = #tpu.pipeline_mode<synchronous>, transform_indices = @transform_2, window_bounds = array<i64: 1, 32>}, {pipeline_mode = #tpu.pipeline_mode<synchronous>, transform_indices = @transform_3, window_bounds = array<i64: 32, 128>}, {pipeline_mode = #tpu.pipeline_mode<synchronous>, transform_indices = @transform_4, window_bounds = array<i64: 1, 128>}, {transform_indices = @transform_5, window_bounds = array<i64: 8, 128>}]} {
    %c0 = arith.constant 0 : index
    %c0_0 = arith.constant 0 : index
    %0 = vector.load %arg1[%c0, %c0_0] : memref<8x64xbf16, #tpu.memory_space<vmem>>, vector<8x64xbf16>
    %c0_1 = arith.constant 0 : index
    %c0_2 = arith.constant 0 : index
    %1 = vector.load %arg2[%c0_1, %c0_2] : memref<64x32xbf16, #tpu.memory_space<vmem>>, vector<64x32xbf16>
    %cst = arith.constant dense<0.000000e+00> : vector<8x32xf32>
    %2 = tpu.matmul %0, %1, %cst {dimension_numbers = #tpu.dot_dimension_numbers<[1], [0], [0], [1], [0, 0, 1, 1], [], []>} : vector<8x64xbf16>, vector<64x32xbf16>, vector<8x32xf32> -> vector<8x32xf32>
    %c0_3 = arith.constant 0 : index
    %c0_4 = arith.constant 0 : index
    %3 = vector.load %arg3[%c0_3, %c0_4] : memref<1x32xf32, #tpu.memory_space<vmem>>, vector<1x32xf32>
    %4 = vector.broadcast %3 : vector<1x32xf32> to vector<8x32xf32>
    %5 = arith.addf %2, %4 : vector<8x32xf32>
    %6 = math.tanh %5 : vector<8x32xf32>
    %7 = arith.truncf %6 : vector<8x32xf32> to vector<8x32xbf16>
    %c0_5 = arith.constant 0 : index
    %c0_6 = arith.constant 0 : index
    %8 = vector.load %arg4[%c0_5, %c0_6] : memref<32x128xbf16, #tpu.memory_space<vmem>>, vector<32x128xbf16>
    %cst_7 = arith.constant dense<0.000000e+00> : vector<8x128xf32>
    %9 = tpu.matmul %7, %8, %cst_7 {dimension_numbers = #tpu.dot_dimension_numbers<[1], [0], [0], [1], [0, 0, 1, 1], [], []>} : vector<8x32xbf16>, vector<32x128xbf16>, vector<8x128xf32> -> vector<8x128xf32>
    %c0_8 = arith.constant 0 : index
    %c0_9 = arith.constant 0 : index
    %10 = vector.load %arg5[%c0_8, %c0_9] : memref<1x128xf32, #tpu.memory_space<vmem>>, vector<1x128xf32>
    %11 = vector.broadcast %10 : vector<1x128xf32> to vector<8x128xf32>
    %12 = arith.addf %9, %11 : vector<8x128xf32>
    %c0_10 = arith.constant 0 : index
    %c0_11 = arith.constant 0 : index
    %13 = vector.load %arg6[%c0_10, %c0_11] : memref<8x128xf32, #tpu.memory_space<vmem>>, vector<8x128xf32>
    tpu.vector_store %arg6[%c0_10, %c0_11], %12 {strides = array<i32>} : memref<8x128xf32, #tpu.memory_space<vmem>>, vector<8x128xf32>,
    return
  }
  func.func @transform_0(%arg0: i32) -> (i32, i32) {
    %c0_i32 = arith.constant 0 : i32
    %c0_i32_0 = arith.constant 0 : i32
    return %arg0, %c0_i32 : i32, i32
  }
  func.func @transform_1(%arg0: i32) -> (i32, i32) {
    %c0_i32 = arith.constant 0 : i32
    %c0_i32_0 = arith.constant 0 : i32
    %c0_i32_1 = arith.constant 0 : i32
    return %c0_i32, %c0_i32_0 : i32, i32
  }
  func.func @transform_2(%arg0: i32) -> (i32, i32) {
    %c0_i32 = arith.constant 0 : i32
    %c0_i32_0 = arith.constant 0 : i32
    %c0_i32_1 = arith.constant 0 : i32
    return %c0_i32, %c0_i32_0 : i32, i32
  }
  func.func @transform_3(%arg0: i32) -> (i32, i32) {
    %c0_i32 = arith.constant 0 : i32
    %c0_i32_0 = arith.constant 0 : i32
    %c0_i32_1 = arith.constant 0 : i32
    return %c0_i32, %c0_i32_0 : i32, i32
  }
  func.func @transform_4(%arg0: i32) -> (i32, i32) {
    %c0_i32 = arith.constant 0 : i32
    %c0_i32_0 = arith.constant 0 : i32
    %c0_i32_1 = arith.constant 0 : i32
    return %c0_i32, %c0_i32_0 : i32, i32
  }
  func.func @transform_5(%arg0: i32) -> (i32, i32) {
    %c0_i32 = arith.constant 0 : i32
    %c0_i32_0 = arith.constant 0 : i32
    return %arg0, %c0_i32 : i32, i32
  }
}

</mosaic_0001>

<bundles_post_ra>
// kernel: tpu_custom_call.1
= control target key start
LH: loop header
LB: loop body
LE: loop exit
PB: predicated region body
PF: predicated region fallthrough
CT: control target
= control target key end

     0   :  { %v263_v1 = vmov 0.0   ;;  %vm264_vm0 = vmmov 0   ;;  %s335_s0 = inlined_call_operand.vmem [shape: bf16[8,64], index: 0, kind: input, shape index: {}]   ;;  %s336_s1 = inlined_call_operand.vmem [shape: bf16[64,32], index: 1, kind: input, shape index: {}]   ;;  %s337_s2 = inlined_call_operand.vmem [shape: f32[1,32], index: 2, kind: input, shape index: {}]   ;;  %s338_s3 = inlined_call_operand.vmem [shape: bf16[32,128], index: 3, kind: input, shape index: {}]   ;;  %s339_s4 = inlined_call_operand.vmem [shape: f32[1,128], index: 4, kind: input, shape index: {}]   ;;  %s340_s5 = inlined_call_operand.hbm [shape: f32[8,128], index: 5, kind: output, shape index: {}]  }
   0x1   :  { %v231_v0 = vld [vmem:[%s336_s1] sm:$0xff]   ;;  %208 = vmatprep.subr.bf16.mxu0 %v263_v1  ;;  %220 = vmatprep.subr.bf16.mxu1 %v263_v1  ;;  %v232_v2 = vld [vmem:[%s336_s1 + $0x8] sm:$0xff]   ;;  %v233_v3 = vld [vmem:[%s336_s1 + $0x10] sm:$0xff]  }
   0x2   :  { %209 = vmatpush3.bf16.msra.mxu0 %v231_v0  ;;  %216 = vmatprep.mubr.msk.bf16.mxu0 %vm264_vm0, %v263_v1 }
   0x3   :  { %210 = vmatprep.subr.bf16.mxu0 %v263_v1  ;;  %224 = vmatprep.mubr.msk.bf16.mxu1 %vm264_vm0, %v263_v1 }
   0x6   :  { %211 = vmatpush3.bf16.msra.mxu0 %v232_v2 }
   0x7   :  { %10 = vsyncpa [#allocation3], 0  ;;  %212 = vmatprep.subr.bf16.mxu0 %v263_v1  ;;  %v234_v4 = vld [vmem:[%s336_s1 + $0x18] sm:$0xff]   ;;  %v22_v5 = vld [vmem:[%s335_s0] sm:$0xf]  ;;  %vm62_vm1 = vcmask 523264  }
   0x8   :  { %v235_v6 = vld [vmem:[%s338_s3] sm:$0xff]   ;;  %v236_v7 = vld [vmem:[%s338_s3 + $0x8] sm:$0xff]   ;;  %vm131_vm2 = vcmask 261120   ;;  %s265_s3 = smov [#allocation2]  }
   0x9   :  { %221 = vmatpush3.bf16.msra.mxu1 %v235_v6  ;;  %v190_v8 = vld [vmem:[%s337_s2] ss:$0 sm:$0xff]  ;;  %s182_s9 = sshll.u32 %s265_s3, 4  ;;  %s183_s9 = int_to_ptr.vmem [resolvable:$true] %s182_s9 }
   0xa   :  { %213 = vmatpush3.bf16.msra.mxu0 %v233_v3  ;;  %222 = vmatprep.subr.bf16.mxu1 %v263_v1  ;;  %v196_v16 = vld [vmem:[%s339_s4] ss:$0 sm:$0xff]  ;;  %s239_s2 = scalar_lea.vmem %s183_s9, 128  ;;  %p244_p1 = scmp.lt.s32.totalorder %s183_s9, %s183_s9 }
   0xb   :  { %214 = vmatprep.subr.bf16.mxu0 %v263_v1  ;;  %p240_p0 = scmp.ne.s32.totalorder %s183_s9, %s239_s2  ;;  %p245_p2 = scmp.lt.s32.totalorder %s239_s2, %s239_s2 }
   0xd   :  { %223 = vmatpush3.bf16.msra.mxu1 %v236_v7  ;;  %p246_p3 = por %p245_p2, %p244_p1 }
   0xe   :  { %215 = vmatpush3.bf16.msra.mxu0 %v234_v4 }
   0xf   :  { %p247_p4 = pnand %p246_p3, %p240_p0 }
  0x11   :  { %217 = vmatmul.mubr.msk.bf16.vlgmr.msra.gmra.mrb[0].mxu0 %vm62_vm1, %v22_v5 }
  0xe4   :  { %v100_v9 = vpop.f32.mrb[0].mxu0 }
  0xe5   :  { %v101_v10 = vadd.f32 %v190_v8, %v100_v9  ;;  %v218_v11 = vpop.f32.mrb[1].mxu0 }
  0xe6   :  { %v103_v12 = vpop.f32.mrb[2].mxu0 }
  0xe7   :  { %237 = vtanh.f32 %v101_v10  ;;  %v219_v13 = vpop.f32.mrb[3].mxu0 }
  0xf1   :  { %v238_v14 = vpop.eup %237 }
  0xf2   :  { %v107_v15 = vpack.c.bf16 %v238_v14, %v238_v14 }
  0xf4   :  { %225 = vmatmul.mubr.msk.bf16.vlgmr.msra.gmra.mrb[0].mxu1 %vm131_vm2, %v107_v15 }
 0x1c7   :  { %v169_v17 = vpop.f32.mrb[0].mxu1 }
 0x1c8   :  { %v170_v18 = vadd.f32 %v196_v16, %v169_v17  ;;  %v226_v19 = vpop.f32.mrb[1].mxu1 }
 0x1c9   :  { %v172_v20 = vpop.f32.mrb[2].mxu1 }
 0x1ca   :  { %175 = vst [vmem:[#allocation2] sm:$0xff] %v170_v18  ;;  %v227_v21 = vpop.f32.mrb[3].mxu1 }
 0x1cb   :  { %250 = shalt.err (!%p247_p4)
}
 0x1cc   :  { %s251_s4 = scalar_lea.hbm %s340_s5, 128 }
 0x1cd   :  { %p252_p5 = scmp.ne.s32.totalorder %s340_s5, %s251_s4  ;;  %p255_p6 = scmp.lt.u32.totalorder %s251_s4, %s340_s5 }
 0x1cf   :  { %p257_p7 = pnand %p255_p6, %p252_p5 }
 0x1d1   :  { %260 = shalt.err (!%p257_p7)
}
 0x1d2   :  { %185 = dma.vmem_to_hbm [thread:$0]  %s183_s9, 128, %s340_s5, [#allocation3]  }
 0x1d3   :  { %261 = dma.done.wait [#allocation3], 128  }
 0x1d4   :  { %262 = vsyncadd [#allocation3], 4294967168 }
 0x1d5   :  { %189 = vsyncpa [#allocation3], 1 }

</bundles_post_ra>
